<compile_context>
chip_gen: v7x
topology: tpu7x:2x2x1
jax: 0.10.0
libtpu: 0.0.40
codegen_flags: <defaults>
</compile_context>

<pallas_src>
import jax
import jax.numpy as jnp
from jax.experimental import pallas as pl
from jax.experimental.pallas import tpu as pltpu


def _unembed_kernel(x_ref, o_ref):
    # x_ref: (TL, C) VMEM tile ; o_ref: (C, TL) VMEM tile.
    # 2-D minor-dim transpose -> XLU.
    o_ref[...] = x_ref[...].T


def _choose_tl(L, C, itemsize, tl=None):
    """Pick an L-tile: multiple of 128 dividing L, ~<=2 MiB per tile."""
    if tl is not None:
        assert L % tl == 0, "explicit tile must divide L"
        return tl
    if L % 128 != 0:
        # Tiny / irregular L: use the full extent (exempt from (8,128) rule).
        return L
    budget = 2 * 1024 * 1024  # ~2 MiB per tile => 4 pipeline buffers <= ~8 MiB
    max_tl = max(128, ((budget // max(1, C * itemsize)) // 128) * 128)
    t = min(L, max_tl)
    while L % t != 0:          # L % 128 == 0, so t = 128 always terminates this
        t -= 128
    return max(t, 128)


def patch_unembed_pallas(x, x_size, embed_dim, tl=None):
    """x: (B, L, C) -> (B, C, H, W) with (H, W) = x_size."""
    B, L, C = x.shape
    H, W = x_size
    assert C == embed_dim, "channel dim must equal embed_dim"
    assert L == H * W, "sequence length must equal H*W"

    itemsize = jnp.dtype(x.dtype).itemsize
    TL = _choose_tl(L, C, itemsize, tl)
    n_l = L // TL

    out_cl = pl.pallas_call(
        _unembed_kernel,
        out_shape=jax.ShapeDtypeStruct((B, C, L), x.dtype),
        grid_spec=pltpu.PrefetchScalarGridSpec(
            num_scalar_prefetch=0,
            grid=(B, n_l),
            in_specs=[
                pl.BlockSpec((pl.Squeezed(), TL, C), lambda b, l: (b, l, 0)),
            ],
            out_specs=pl.BlockSpec((pl.Squeezed(), C, TL), lambda b, l: (b, 0, l)),
        ),
        compiler_params=pltpu.CompilerParams(
            dimension_semantics=("parallel", "parallel")),
        cost_estimate=pl.CostEstimate(
            flops=0,
            transcendentals=0,
            bytes_accessed=2 * B * L * C * itemsize),
    )(x)

    # Contiguous view (B, C, L) -> (B, C, H, W): metadata-only reshape (glue).
    return out_cl.reshape(B, C, H, W)


class PatchUnEmbed:
    """JAX/Pallas port of PatchUnEmbed (img_size/patch_size kept for parity)."""

    def __init__(self, img_size=224, patch_size=4, in_chans=3, embed_dim=96,
                 norm_layer=None):
        if isinstance(img_size, int):
            img_size = (img_size, img_size)
        if isinstance(patch_size, int):
            patch_size = (patch_size, patch_size)
        self.img_size = img_size
        self.patch_size = patch_size
        self.patches_resolution = [img_size[0] // patch_size[0],
                                   img_size[1] // patch_size[1]]
        self.num_patches = self.patches_resolution[0] * self.patches_resolution[1]
        self.in_chans = in_chans
        self.embed_dim = embed_dim
        # No parameters in this module (norm_layer is unused in the original too).

    def __call__(self, x, x_size, tl=None):
        return patch_unembed_pallas(x, x_size, self.embed_dim, tl=tl)


if __name__ == "__main__":
    key = jax.random.PRNGKey(0)

    # Case 1: small shape (L=64 not a multiple of 128 -> full-extent fallback path).
    B, C, H, W = 2, 32, 8, 8
    L = H * W
    x = jax.random.normal(key, (B, L, C), dtype=jnp.float32)
    module = PatchUnEmbed(img_size=(H, W), patch_size=1, in_chans=3, embed_dim=C)
    out = jax.block_until_ready(module(x, (H, W)))
    ref = jnp.swapaxes(x, 1, 2).reshape(B, C, H, W)
    assert out.shape == (B, C, H, W) and out.dtype == x.dtype
    assert jnp.array_equal(out, ref), "mismatch vs reference (case 1)"

    # Case 2: L multiple of 128 with an explicit TL=128 to exercise the tiled
    # grid path (grid = (B, L//TL) with 2 L-tiles).
    B2, C2, H2, W2 = 2, 32, 16, 16
    L2 = H2 * W2
    x2 = jax.random.normal(jax.random.PRNGKey(0), (B2, L2, C2), dtype=jnp.float32)
    module2 = PatchUnEmbed(img_size=(H2, W2), patch_size=1, in_chans=3, embed_dim=C2)
    out2 = jax.block_until_ready(module2(x2, (H2, W2), tl=128))
    ref2 = jnp.swapaxes(x2, 1, 2).reshape(B2, C2, H2, W2)
    assert out2.shape == (B2, C2, H2, W2) and out2.dtype == x2.dtype
    assert jnp.array_equal(out2, ref2), "mismatch vs reference (case 2)"

    print("KERNEL_OK")
</pallas_src>

<mosaic_0001>
module attributes {stable_mosaic.version = 11 : i64} {
  func.func @_unembed_kernel(%arg0: i32, %arg1: i32, %arg2: memref<1x64x32xf32, #tpu.memory_space<vmem>>, %arg3: memref<1x32x64xf32, #tpu.memory_space<vmem>>) attributes {dimension_semantics = [#tpu.dimension_semantics<parallel>, #tpu.dimension_semantics<parallel>], iteration_bounds = array<i64: 2, 1>, scalar_prefetch = 0 : i64, scratch_operands = 0 : i64, tpu.core_type = #tpu.core_type<tc>, window_params = [{transform_indices = @transform_0, window_bounds = array<i64: 1, 64, 32>}, {transform_indices = @transform_1, window_bounds = array<i64: 1, 32, 64>}]} {
    %c0 = arith.constant 0 : index
    %c0_0 = arith.constant 0 : index
    %c0_1 = arith.constant 0 : index
    %0 = vector.load %arg2[%c0, %c0_0, %c0_1] : memref<1x64x32xf32, #tpu.memory_space<vmem>>, vector<1x64x32xf32>
    %1 = vector.shape_cast %0 : vector<1x64x32xf32> to vector<64x32xf32>
    %2 = tpu.transpose %1, [1, 0] : vector<64x32xf32> -> vector<32x64xf32>
    %c0_2 = arith.constant 0 : index
    %c0_3 = arith.constant 0 : index
    %c0_4 = arith.constant 0 : index
    %3 = vector.load %arg3[%c0_2, %c0_3, %c0_4] : memref<1x32x64xf32, #tpu.memory_space<vmem>>, vector<1x32x64xf32>
    %4 = vector.shape_cast %3 : vector<1x32x64xf32> to vector<32x64xf32>
    %5 = vector.shape_cast %2 : vector<32x64xf32> to vector<1x32x64xf32>
    tpu.vector_store %arg3[%c0_2, %c0_3, %c0_4], %5 {strides = array<i32>} : memref<1x32x64xf32, #tpu.memory_space<vmem>>, vector<1x32x64xf32>,
    return
  }
  func.func @transform_0(%arg0: i32, %arg1: i32) -> (i32, i32, i32) {
    %c0_i32 = arith.constant 0 : i32
    %c0_i32_0 = arith.constant 0 : i32
    return %arg0, %arg1, %c0_i32 : i32, i32, i32
  }
  func.func @transform_1(%arg0: i32, %arg1: i32) -> (i32, i32, i32) {
    %c0_i32 = arith.constant 0 : i32
    %c0_i32_0 = arith.constant 0 : i32
    return %arg0, %c0_i32, %arg1 : i32, i32, i32
  }
}

</mosaic_0001>

<bundles_post_ra>
// kernel: tpu_custom_call.1
= control target key start
LH: loop header
LB: loop body
LE: loop exit
PB: predicated region body
PF: predicated region fallthrough
CT: control target
= control target key end

     0   :  { %6 = vsyncpa [#allocation3], 0  ;;  %s564_s0 = inlined_call_operand.vmem [shape: f32[2,64,32], index: 0, kind: input, shape index: {}]   ;;  %s565_s1 = inlined_call_operand.hbm [shape: f32[2,32,64], index: 1, kind: output, shape index: {}]  }
   0x1   :  { %8 = vsyncpa [#allocation3 + $0x1], 0  ;;  %s449_s6 = smov 0   ;;  %s451_s7 = smov 0  }
   0x2   :  { %s453_s8 = smov 0   ;;  %s455_s9 = smov 0  }
   0x3   :  { %s457_s10 = smov 0   ;;  %s459_s11 = smov 0  }
   0x4 LB: > { %s283_s12 = sadd.s32 4294967295, %s434_s11   ;;  %s284_s13 = sadd.s32 4294967294, %s434_s11   ;;  %s434_s11 = sphi %s459_s11, %s14_s11   ;;  %s430_s10 = sphi %s457_s10, %s572_s10   ;;  %s426_s9 = sphi %s455_s9, %s571_s9   ;;  %s422_s8 = sphi %s453_s8, %s570_s8   ;;  %s418_s7 = sphi %s451_s7, %s569_s7   ;;  %s414_s6 = sphi %s449_s6, %s568_s6  }
   0x5   : > { %s26_s14 = sadd.s32 1, %s430_s10  ;;  %s63_s15 = sadd.s32 1, %s422_s8 }
   0x6   : > { %p28_p0 = scmp.ge.s32.totalorder %s26_s14, 2  ;;  %p73_p1 = scmp.ne.s32.totalorder %s422_s8, %s418_s7 }
   0x7   : > { %p74_p2 = scmp.eq.s32.totalorder %s283_s12, 1  ;;  %p79_p3 = scmp.ne.s32.totalorder %s418_s7, %s414_s6 }
   0x8   : > { %s574_s14 = smov (%p28_p0, %s26_s14), 0  ;;  %p80_p5 = scmp.eq.s32.totalorder %s284_s13, 1 }
   0x9   : > { %p489_p4 = por %p74_p2, %p73_p1  ;;  %s58_s17 = ssub.s32 %s430_s10, %s574_s14 }
   0xa   : > { %p287_p6 = scmp.ge.s32.totalorder %s434_s11, 1  ;;  %p61_p7 = scmp.eq.s32.totalorder %s58_s17, 0 }
   0xb   : > { %p496_p8 = por %p80_p5, %p79_p3  ;;  %p111_p9 = scmp.lt.s32.totalorder %s434_s11, 3 }
   0xc   : > { %s502_s19 = scalar_select %p61_p7, %s422_s8, %s63_s15  }
   0xd   : > { %p112_p10 = pnand %p287_p6, %p111_p9 }
   0xe   : > { %p136_p11 = scmp.lt.s32.totalorder (!%p112_p10), %s426_s9, 1  ;;  %s132_s25 = sand.u32 (!%p112_p10), 1, %s418_s7   ;;  %vm185_vm0 = vcmask (!%p112_p10), 523264  }
   0xf   : > { %115 = sbr.rel (%p112_p10) target bundleno = 183 (0xb7), region = 24  ;;  %s288_s26 = sshll.u32 (!%p112_p10), %s132_s25, 5 }
  0x10   : > { %s134_s27 = scalar_lea.vmem (!%p112_p10), [#allocation2], %s288_s26  ;;  %s297_s29 = sshll.u32 (!%p112_p10), %s426_s9, 9 }
  0x11   : > { %s205_s28 = sshll.u32 (!%p112_p10), %s134_s27, 4  ;;  %s516_s3 = scalar_lea.hbm (!%p112_p10), %s565_s1, %s297_s29  ;;  %s511_s28 = int_to_ptr.vmem [resolvable:$true] %s205_s28 }
  0x12   : > { %s518_s4 = scalar_lea.sflag (!%p112_p10), [#allocation3], %s132_s25  ;;  %s356_s5 = scalar_lea.vmem (!%p112_p10), %s511_s28, 512 }
  0x13   : > { %p357_p12 = scmp.ne.s32.totalorder (!%p112_p10), %s511_s28, %s356_s5 }
  0x15   : > { %p358_p13 = pnand (!%p112_p10), %p357_p12, %p489_p4 }
  0x16   : > { %s137_s20 = scalar_select %p136_p11, %s426_s9, 1 }
  0x17   : > { %p359_p0 = pneg %p358_p13  ;;  %s436_s9 = smov [#allocation2]  }
  0x18   : > { %s296_s21 = sshll.u32 %s137_s20, 6  ;;  %s360_s12 = sshll.u32 %s436_s9, 4  ;;  %s361_s12 = int_to_ptr.vmem [resolvable:$false] %s360_s12 }
  0x19   : > { %s143_s24 = scalar_lea.vmem %s564_s0, %s296_s21  ;;  %s362_s13 = scalar_lea.vmem %s361_s12, 1024 }
  0x1a   : > { %v145_v0 = vld [vmem:[%s143_s24] sm:$0xff]  ;;  %v146_v1 = vld [vmem:[%s143_s24 + $0x8] sm:$0xff]  ;;  %v147_v2 = vld [vmem:[%s143_s24 + $0x10] sm:$0xff]  ;;  %p363_p1 = scmp.lt.s32.totalorder %s511_s28, %s361_s12  ;;  %p364_p2 = scmp.lt.s32.totalorder %s362_s13, %s356_s5 }
  0x1b   : > { %153 = vxpose.xlu0.b32.start [1/8] (short) (narrow) %v145_v0, 32  ;;  %v148_v3 = vld [vmem:[%s143_s24 + $0x18] sm:$0xff]  ;;  %v149_v4 = vld [vmem:[%s143_s24 + $0x20] sm:$0xff]  ;;  %v150_v5 = vld [vmem:[%s143_s24 + $0x28] sm:$0xff] }
  0x1c   : > { %v151_v6 = vld [vmem:[%s143_s24 + $0x30] sm:$0xff]  ;;  %v152_v7 = vld [vmem:[%s143_s24 + $0x38] sm:$0xff]  ;;  %p365_p3 = por %p364_p2, %p363_p1 }
  0x1e   : > { %p366_p5 = pnand %p365_p3, %p359_p0 }
  0x1f   : > { %154 = vxpose.xlu0.b32.cont [2/8] (short) (narrow) %v146_v1, 32 }
  0x23   : > { %155 = vxpose.xlu0.b32.cont [3/8] (short) (narrow) %v147_v2, 32 }
  0x27   : > { %156 = vxpose.xlu0.b32.cont [4/8] (short) (narrow) %v148_v3, 32 }
  0x2b   : > { %157 = vxpose.xlu0.b32.cont [5/8] (short) (narrow) %v149_v4, 32 }
  0x2f   : > { %158 = vxpose.xlu0.b32.cont [6/8] (short) (narrow) %v150_v5, 32 }
  0x33   : > { %159 = vxpose.xlu0.b32.cont [7/8] (short) (narrow) %v151_v6, 32 }
  0x37   : > { %160 = vxpose.xlu0.b32.end [8/8] (short) (narrow) %v152_v7, 32 }
  0x9b   : > { %v169_v8 = vpop.trf.xlu0 }
  0x9c   : > { %186 = vst.msk [vmem:[%s134_s27] sm:$0xff] %vm185_vm0, %v169_v8 }
  0x9f   : > { %v170_v9 = vpop.trf.xlu0 }
  0xa0   : > { %187 = vst.msk [vmem:[%s134_s27 + $0x8] sm:$0xff] %vm185_vm0, %v170_v9 }
  0xa3   : > { %v171_v10 = vpop.trf.xlu0 }
  0xa4   : > { %188 = vst.msk [vmem:[%s134_s27 + $0x10] sm:$0xff] %vm185_vm0, %v171_v10 }
  0xa7   : > { %v172_v11 = vpop.trf.xlu0 }
  0xa8   : > { %189 = vst.msk [vmem:[%s134_s27 + $0x18] sm:$0xff] %vm185_vm0, %v172_v11 }
  0xa9   : > { %369 = shalt.err (!%p366_p5)
}
  0xaa   : > { %s370_s15 = scalar_lea.hbm %s516_s3, 512  ;;  %s374_s21 = scalar_lea.hbm %s565_s1, 1024 }
  0xab   : > { %p371_p6 = scmp.ne.s32.totalorder %s516_s3, %s370_s15  ;;  %p375_p10 = scmp.lt.u32.totalorder %s516_s3, %s565_s1 }
  0xac   : > { %p376_p11 = scmp.lt.u32.totalorder %s374_s21, %s370_s15  ;;  %p378_p13 = scmp.lt.u32.totalorder %s370_s15, %s516_s3 }
  0xad   : > { %p372_p7 = pnand %p371_p6, %p489_p4 }
  0xae   : > { %p377_p12 = por %p376_p11, %p375_p10 }
  0xaf   : > { %p373_p9 = pneg %p372_p7 }
  0xb0   : > { %p379_p0 = por %p378_p13, %p377_p12 }
  0xb2   : > { %p380_p1 = pnand %p379_p0, %p373_p9 }
  0xb4   : > { %383 = shalt.err (!%p380_p1)
}
  0xb5   : > { %s437_s24 = smov 128   ;;  %s438_s25 = smov 8  }
  0xb6   : > { %298 = dma.vmem_to_hbm [thread:$0]  (%p489_p4), %s511_s28, 512, %s516_s3, %s518_s4, %s437_s24, %s437_s24, %s438_s25  }
  0xb7 PF: > { %p304_p2 = scmp.ge.s32.totalorder %s434_s11, 2  ;;  %s220_s26 = sand.u32 1, %s414_s6  }
  0xb8   : > { %s221_s27 = scalar_lea.sflag [#allocation3], %s220_s26 }
  0xb9   : > { %p301_p3 = pnand %p304_p2, %p496_p8 }
  0xbb   : > { %409 = dma.done.wait (!%p301_p3), %s221_s27, 512  }
  0xbc   : > { %411 = vsyncadd (!%p301_p3), %s221_s27, 4294966784  ;;  %s14_s11 = sadd.s32 1, %s434_s11   ;;  %s568_s6 = smov %s418_s7 }
  0xbd   : > { %p11_p5 = scmp.ge.s32.totalorder %s14_s11, 4   ;;  %s569_s7 = smov %s422_s8 }
  0xbe   : > { %s570_s8 = smov %s502_s19  ;;  %s571_s9 = smov %s430_s10 }
  0xbf   : > { %s572_s10 = smov %s574_s14  ;;  %13 = sbr.rel (!%p11_p5) target bundleno = 4 (0x4), region = 59 }
  0xc6   :  { %226 = vsyncpa [#allocation3], 1 }
  0xc7   :  { %228 = vsyncpa [#allocation3 + $0x1], 1 }

</bundles_post_ra>
